<compile_context>
chip_gen: v6e
topology: v6e:2x2x1
jax: 0.10.0
libtpu: 0.0.40
codegen_flags: <defaults>
</compile_context>

<pallas_src>
import functools
import math

import jax
import jax.numpy as jnp
from jax.experimental import pallas as pl
from jax.experimental.pallas import tpu as pltpu


# ---------------------------------------------------------------------------
# small helpers
# ---------------------------------------------------------------------------

def _round_up(x, m):
    return (x + m - 1) // m * m


def _pad_rows(x2d, tm):
    """Pad rows to a multiple of the (clamped) row tile; returns (padded, tm_eff, n)."""
    n = x2d.shape[0]
    tm_eff = min(_round_up(tm, 16), _round_up(n, 16))   # 16-row multiple: bf16 sublanes
    n_pad = _round_up(n, tm_eff)
    if n_pad != n:
        x2d = jnp.pad(x2d, ((0, n_pad - n), (0, 0)))
    return x2d, tm_eff, n


_SINGLE_BUFFER = [True]   # flipped off if this jax build rejects pl.Buffered(1)


def _invariant_spec(block_shape, index_map):
    """BlockSpec for a block whose index never changes over the grid (weights,
    biases, LayerNorm params): single-buffer it to halve its VMEM footprint --
    it is never re-fetched, so double-buffering is pure waste."""
    if _SINGLE_BUFFER[0]:
        return pl.BlockSpec(block_shape, index_map,
                            pipeline_mode=pl.Buffered(buffer_count=1))
    return pl.BlockSpec(block_shape, index_map)


_VMEM_LIMIT_CACHE = []


def _vmem_limit_bytes():
    """~75% of physical VMEM (48 MiB on v7x's 64 MiB, capped at 96 MiB on
    v5e/v6e's 128 MiB) -- well above the 16/32 MiB scoped defaults."""
    if not _VMEM_LIMIT_CACHE:
        try:
            cap = int(pltpu.get_tpu_info().vmem_capacity_bytes)
            _VMEM_LIMIT_CACHE.append(min(96 * 1024 * 1024, (cap * 3) // 4))
        except Exception:
            _VMEM_LIMIT_CACHE.append(None)   # unknown chip: keep compiler default
    return _VMEM_LIMIT_CACHE[0]


def _compiler_params(dimension_semantics):
    limit = _vmem_limit_bytes()
    if limit is None:
        return pltpu.CompilerParams(dimension_semantics=dimension_semantics)
    return pltpu.CompilerParams(dimension_semantics=dimension_semantics,
                                vmem_limit_bytes=limit)


# Module-level index maps (shared across layers so specs hash identically).
def _rows_i(i):      return (i, 0)
def _fixed_i(i):     return (0, 0)
def _rows_ij(i, j):  return (i, 0)
def _w1_ij(i, j):    return (0, j)
def _w2_ij(i, j):    return (j, 0)
def _fixed_ij(i, j): return (0, 0)
def _bh_b(b):        return (b, 0, 0)


# ---------------------------------------------------------------------------
# kernels
# ---------------------------------------------------------------------------

def _linear_kernel(x_ref, w_ref, b_ref, o_ref):
    # x: (tm, d_in)  w: (d_in, d_out)  b: (1, d_out) f32  o: (tm, d_out)
    y = jnp.dot(x_ref[...], w_ref[...], preferred_element_type=jnp.float32)
    o_ref[...] = (y + b_ref[...]).astype(o_ref.dtype)


def _attention_kernel(q_ref, k_ref, v_ref, o_ref, *, scale):
    # q/k/v: (S, Dh) for one (batch, head); softmax in f32, matmuls on the MXU.
    q = q_ref[...]
    k = k_ref[...]
    v = v_ref[...]
    s = jnp.einsum("qd,kd->qk", q, k, preferred_element_type=jnp.float32) * scale
    s = s - jnp.max(s, axis=-1, keepdims=True)
    p = jnp.exp(s)
    p = p / jnp.sum(p, axis=-1, keepdims=True)
    o = jnp.dot(p.astype(v.dtype), v, preferred_element_type=jnp.float32)
    o_ref[...] = o.astype(o_ref.dtype)


def _layer_norm_f32(y, g, b, eps):
    mu = jnp.mean(y, axis=-1, keepdims=True)
    yc = y - mu
    var = jnp.mean(yc * yc, axis=-1, keepdims=True)
    return yc * jax.lax.rsqrt(var + eps) * g + b


def _linear_addnorm_kernel(a_ref, w_ref, b_ref, r_ref, g_ref, beta_ref, o_ref, *, eps):
    # LayerNorm(residual + a @ W + b), fused over one row tile.
    y = jnp.dot(a_ref[...], w_ref[...], preferred_element_type=jnp.float32)
    y = y + b_ref[...] + r_ref[...].astype(jnp.float32)
    o_ref[...] = _layer_norm_f32(y, g_ref[...], beta_ref[...], eps).astype(o_ref.dtype)


def _ffn_addnorm_kernel(x_ref, w1_ref, b1_ref, w2_ref, b2_ref, g_ref, beta_ref,
                        o_ref, acc_ref, *, eps):
    # grid = (row tiles, d_ff chunks); acc_ref is a (tm, d_model) f32 accumulator.
    j = pl.program_id(1)

    @pl.when(j == 0)
    def _init():
        acc_ref[...] = jnp.zeros_like(acc_ref)

    w1 = w1_ref[...]
    h = jnp.dot(x_ref[...], w1, preferred_element_type=jnp.float32)
    h = jnp.maximum(h + b1_ref[...], 0.0)                         # ReLU
    # TODO(synk): training-mode dropout on `h` omitted (identity / eval mode).
    acc_ref[...] += jnp.dot(h.astype(w1.dtype), w2_ref[...],
                            preferred_element_type=jnp.float32)

    @pl.when(j == pl.num_programs(1) - 1)
    def _finalize():
        # Bias, residual and LayerNorm applied once, at the last d_ff chunk.
        y = acc_ref[...] + b2_ref[...] + x_ref[...].astype(jnp.float32)
        o_ref[...] = _layer_norm_f32(y, g_ref[...], beta_ref[...], eps).astype(o_ref.dtype)


# ---------------------------------------------------------------------------
# pallas_call wrappers
# ---------------------------------------------------------------------------

def _linear(x2d, w, b, *, compute_dtype, tm):
    """y = x @ W + b, row-tiled; W stays resident (single-buffered) across the grid."""
    d_in, d_out = w.shape
    xp, tm_eff, n = _pad_rows(x2d.astype(compute_dtype), tm)
    n_pad = xp.shape[0]
    wc = w.astype(compute_dtype)
    bc = b.reshape(1, d_out).astype(jnp.float32)
    isz = jnp.dtype(compute_dtype).itemsize
    cost = pl.CostEstimate(
        flops=2 * n_pad * d_in * d_out,
        transcendentals=0,
        bytes_accessed=(n_pad * d_in + d_in * d_out + n_pad * d_out) * isz + d_out * 4,
    )
    out = pl.pallas_call(
        _linear_kernel,
        out_shape=jax.ShapeDtypeStruct((n_pad, d_out), compute_dtype),
        grid_spec=pltpu.PrefetchScalarGridSpec(
            num_scalar_prefetch=0,
            grid=(n_pad // tm_eff,),
            in_specs=[
                pl.BlockSpec((tm_eff, d_in), _rows_i),
                _invariant_spec((d_in, d_out), _fixed_i),
                _invariant_spec((1, d_out), _fixed_i),
            ],
            out_specs=pl.BlockSpec((tm_eff, d_out), _rows_i),
        ),
        compiler_params=_compiler_params(("parallel",)),
        cost_estimate=cost,
    )(xp, wc, bc)
    return out[:n]


def _attention(q, k, v, *, compute_dtype):
    """softmax(q k^T / sqrt(d_head)) v, one (batch, head) per grid step."""
    bh, s, dh = q.shape
    kern = functools.partial(_attention_kernel, scale=1.0 / math.sqrt(dh))
    isz = jnp.dtype(compute_dtype).itemsize
    cost = pl.CostEstimate(
        flops=4 * bh * s * s * dh,
        transcendentals=bh * s * s,
        bytes_accessed=4 * bh * s * dh * isz,
    )
    spec = pl.BlockSpec((None, s, dh), _bh_b)
    return pl.pallas_call(
        kern,
        out_shape=jax.ShapeDtypeStruct((bh, s, dh), compute_dtype),
        grid_spec=pltpu.PrefetchScalarGridSpec(
            num_scalar_prefetch=0,
            grid=(bh,),
            in_specs=[spec, spec, spec],
            out_specs=spec,
        ),
        compiler_params=_compiler_params(("parallel",)),
        cost_estimate=cost,
    )(q.astype(compute_dtype), k.astype(compute_dtype), v.astype(compute_dtype))


def _linear_addnorm(a2d, w, b, r2d, gamma, beta, *, compute_dtype, tm, eps=1e-5):
    """LayerNorm(residual + a @ W + b): attention output-projection sublayer."""
    d_in, d_out = w.shape
    ap, tm_eff, n = _pad_rows(a2d.astype(compute_dtype), tm)
    rp, _, _ = _pad_rows(r2d.astype(compute_dtype), tm)
    n_pad = ap.shape[0]
    wc = w.astype(compute_dtype)
    bc = b.reshape(1, d_out).astype(jnp.float32)
    g = gamma.reshape(1, d_out).astype(jnp.float32)
    bb = beta.reshape(1, d_out).astype(jnp.float32)
    isz = jnp.dtype(compute_dtype).itemsize
    cost = pl.CostEstimate(
        flops=2 * n_pad * d_in * d_out + 8 * n_pad * d_out,
        transcendentals=n_pad,
        bytes_accessed=(2 * n_pad * d_in + d_in * d_out + n_pad * d_out) * isz
                       + 3 * d_out * 4,
    )
    out = pl.pallas_call(
        functools.partial(_linear_addnorm_kernel, eps=eps),
        out_shape=jax.ShapeDtypeStruct((n_pad, d_out), compute_dtype),
        grid_spec=pltpu.PrefetchScalarGridSpec(
            num_scalar_prefetch=0,
            grid=(n_pad // tm_eff,),
            in_specs=[
                pl.BlockSpec((tm_eff, d_in), _rows_i),
                _invariant_spec((d_in, d_out), _fixed_i),
                _invariant_spec((1, d_out), _fixed_i),
                pl.BlockSpec((tm_eff, d_out), _rows_i),      # residual
                _invariant_spec((1, d_out), _fixed_i),       # LN gamma
                _invariant_spec((1, d_out), _fixed_i),       # LN beta
            ],
            out_specs=pl.BlockSpec((tm_eff, d_out), _rows_i),
        ),
        compiler_params=_compiler_params(("parallel",)),
        cost_estimate=cost,
    )(ap, wc, bc, rp, g, bb)
    return out[:n]


def _ffn_addnorm(x2d, w1, b1, w2, b2, gamma, beta, *, compute_dtype, tm, tff, eps=1e-5):
    """LayerNorm(x + W2 relu(W1 x + b1) + b2): position-wise FFN sublayer.

    d_ff is tiled (grid axis 1, 'arbitrary') with an f32 scratch accumulator so
    the resident working set stays bounded regardless of d_ff."""
    d_model, d_ff = w1.shape
    xp, tm_eff, n = _pad_rows(x2d.astype(compute_dtype), tm)
    n_pad = xp.shape[0]

    tff_eff = min(_round_up(tff, 128), d_ff)
    d_ff_pad = _round_up(d_ff, tff_eff)
    w1c = w1.astype(compute_dtype)
    w2c = w2.astype(compute_dtype)
    b1c = b1.reshape(1, d_ff).astype(jnp.float32)
    if d_ff_pad != d_ff:   # zero-padded d_ff chunks contribute exactly 0
        w1c = jnp.pad(w1c, ((0, 0), (0, d_ff_pad - d_ff)))
        b1c = jnp.pad(b1c, ((0, 0), (0, d_ff_pad - d_ff)))
        w2c = jnp.pad(w2c, ((0, d_ff_pad - d_ff), (0, 0)))
    b2c = b2.reshape(1, d_model).astype(jnp.float32)
    g = gamma.reshape(1, d_model).astype(jnp.float32)
    bb = beta.reshape(1, d_model).astype(jnp.float32)

    isz = jnp.dtype(compute_dtype).itemsize
    cost = pl.CostEstimate(
        flops=4 * n_pad * d_model * d_ff_pad + 8 * n_pad * d_model,
        transcendentals=n_pad,
        bytes_accessed=(2 * n_pad * d_model + 2 * d_model * d_ff_pad) * isz
                       + (d_ff_pad + 3 * d_model) * 4,
    )
    out = pl.pallas_call(
        functools.partial(_ffn_addnorm_kernel, eps=eps),
        out_shape=jax.ShapeDtypeStruct((n_pad, d_model), compute_dtype),
        grid_spec=pltpu.PrefetchScalarGridSpec(
            num_scalar_prefetch=0,
            grid=(n_pad // tm_eff, d_ff_pad // tff_eff),     # reduction axis last
            in_specs=[
                pl.BlockSpec((tm_eff, d_model), _rows_ij),   # x (also the residual)
                pl.BlockSpec((d_model, tff_eff), _w1_ij),    # W1 d_ff chunk
                pl.BlockSpec((1, tff_eff), _w1_ij),          # b1 d_ff chunk
                pl.BlockSpec((tff_eff, d_model), _w2_ij),    # W2 d_ff chunk
                _invariant_spec((1, d_model), _fixed_ij),    # b2
                _invariant_spec((1, d_model), _fixed_ij),    # LN gamma
                _invariant_spec((1, d_model), _fixed_ij),    # LN beta
            ],
            out_specs=pl.BlockSpec((tm_eff, d_model), _rows_ij),
            scratch_shapes=[pltpu.VMEM((tm_eff, d_model), jnp.float32)],
        ),
        compiler_params=_compiler_params(("parallel", "arbitrary")),
        cost_estimate=cost,
    )(xp, w1c, b1c, w2c, b2c, g, bb)
    return out[:n]


# ---------------------------------------------------------------------------
# transformer forward
# ---------------------------------------------------------------------------

def _encoder_layer(feat, p, *, n_heads, compute_dtype, tm, tff):
    B, S, D = feat.shape
    H = n_heads
    Dh = D // H
    x2d = feat.reshape(B * S, D)

    # ---- multi-head self-attention sublayer (q = k = v = feat) ----
    qkv = _linear(x2d, p["w_qkv"], p["b_qkv"], compute_dtype=compute_dtype, tm=tm)
    q, k, v = jnp.split(qkv, 3, axis=-1)

    def to_heads(t):   # (B*S, D) -> (B*H, S, Dh)   -- layout plumbing, not compute
        return t.reshape(B, S, H, Dh).transpose(0, 2, 1, 3).reshape(B * H, S, Dh)

    attn = _attention(to_heads(q), to_heads(k), to_heads(v), compute_dtype=compute_dtype)
    attn = attn.reshape(B, H, S, Dh).transpose(0, 2, 1, 3).reshape(B * S, D)
    x2d = _linear_addnorm(attn, p["w_o"], p["b_o"], x2d, p["ln1_g"], p["ln1_b"],
                          compute_dtype=compute_dtype, tm=tm)

    # ---- position-wise feed-forward sublayer ----
    x2d = _ffn_addnorm(x2d, p["w1"], p["b1"], p["w2"], p["b2"], p["ln2_g"], p["ln2_b"],
                       compute_dtype=compute_dtype, tm=tm, tff=tff)
    return x2d.reshape(B, S, D)


def multilayer_transformer(feat, layer_params, *, n_heads,
                           compute_dtype=jnp.bfloat16, tm=256, tff=512):
    """Forward pass of MultilayerTransformer: feat = layer_i(feat, feat, feat)."""
    assert feat.ndim == 3 and feat.shape[-1] % n_heads == 0

    def run():
        x = feat
        for p in layer_params:
            x = _encoder_layer(x, p, n_heads=n_heads, compute_dtype=compute_dtype,
                               tm=tm, tff=tff)
        return x.astype(feat.dtype)

    if _SINGLE_BUFFER[0]:
        try:
            return run()
        except Exception:
            # This jax build rejected single-buffered invariant blocks
            # (pl.Buffered(1)); retry with default double-buffered specs.
            _SINGLE_BUFFER[0] = False
    return run()


# ---------------------------------------------------------------------------
# pure-JAX reference & demo
# ---------------------------------------------------------------------------

def _layer_norm_ref(x, g, b, eps=1e-5):
    mu = jnp.mean(x, axis=-1, keepdims=True)
    var = jnp.mean(jnp.square(x - mu), axis=-1, keepdims=True)
    return (x - mu) * jax.lax.rsqrt(var + eps) * g + b


def _ref_layer(x, p, n_heads):
    B, S, D = x.shape
    H, Dh = n_heads, D // n_heads
    hi = jax.lax.Precision.HIGHEST
    qkv = jnp.dot(x, p["w_qkv"], precision=hi) + p["b_qkv"]
    q, k, v = jnp.split(qkv, 3, axis=-1)
    heads = lambda t: t.reshape(B, S, H, Dh).transpose(0, 2, 1, 3)
    q, k, v = heads(q), heads(k), heads(v)
    s = jnp.einsum("bhqd,bhkd->bhqk", q, k, precision=hi) / math.sqrt(Dh)
    a = jax.nn.softmax(s, axis=-1)
    o = jnp.einsum("bhqk,bhkd->bhqd", a, v, precision=hi)
    o = o.transpose(0, 2, 1, 3).reshape(B, S, D)
    x = _layer_norm_ref(x + jnp.dot(o, p["w_o"], precision=hi) + p["b_o"],
                        p["ln1_g"], p["ln1_b"])
    h = jnp.maximum(jnp.dot(x, p["w1"], precision=hi) + p["b1"], 0.0)
    return _layer_norm_ref(x + jnp.dot(h, p["w2"], precision=hi) + p["b2"],
                           p["ln2_g"], p["ln2_b"])


def _init_layer_params(key, d_model, d_ff):
    ks = jax.random.split(key, 8)

    def lin(k, fan_in, shape):   # nn.Linear-like uniform init
        bound = 1.0 / math.sqrt(fan_in)
        return jax.random.uniform(k, shape, jnp.float32, -bound, bound)

    return {
        "w_qkv": lin(ks[0], d_model, (d_model, 3 * d_model)),
        "b_qkv": lin(ks[1], d_model, (3 * d_model,)),
        "w_o": lin(ks[2], d_model, (d_model, d_model)),
        "b_o": lin(ks[3], d_model, (d_model,)),
        "ln1_g": jnp.ones((d_model,), jnp.float32),
        "ln1_b": jnp.zeros((d_model,), jnp.float32),
        "w1": lin(ks[4], d_model, (d_model, d_ff)),
        "b1": lin(ks[5], d_model, (d_ff,)),
        "w2": lin(ks[6], d_ff, (d_ff, d_model)),
        "b2": lin(ks[7], d_ff, (d_model,)),
        "ln2_g": jnp.ones((d_model,), jnp.float32),
        "ln2_b": jnp.zeros((d_model,), jnp.float32),
    }


if __name__ == "__main__":
    # Small but lane-dense shapes: d_model is a multiple of 128 so every matmul
    # output slab is lane-dense (unmasked stores); batch*seq stays tiny.
    batch, seq, d_model, n_heads, d_ff, n_layers = 2, 8, 128, 4, 256, 2

    key = jax.random.PRNGKey(0)
    keys = jax.random.split(key, n_layers + 1)
    x = jax.random.normal(keys[0], (batch, seq, d_model), dtype=jnp.float32)
    params = [_init_layer_params(keys[i + 1], d_model, d_ff) for i in range(n_layers)]

    # Pure-JAX f32 reference (HIGHEST matmul precision).
    ref = x
    for p in params:
        ref = _ref_layer(ref, p, n_heads)
    ref = jax.block_until_ready(ref)

    # 1) f32 compute path: validates kernel structure / indexing tightly.
    out_f32 = jax.block_until_ready(
        multilayer_transformer(x, params, n_heads=n_heads, compute_dtype=jnp.float32))
    assert out_f32.shape == x.shape
    err32 = float(jnp.max(jnp.abs(out_f32 - ref)))
    assert jnp.allclose(out_f32, ref, atol=2e-2, rtol=2e-2), f"f32 path max err {err32}"

    # 2) default bf16 fast path (MXU-native operands, f32 accumulation): the
    #    recommended production configuration; mixed-precision tolerance.
    out_bf16 = jax.block_until_ready(
        multilayer_transformer(x, params, n_heads=n_heads))
    assert out_bf16.shape == x.shape
    rel = float(jnp.linalg.norm(out_bf16 - ref) / jnp.linalg.norm(ref))
    assert rel < 5e-2, f"bf16 path relative error {rel}"

    print("KERNEL_OK")
</pallas_src>

<mosaic_0001>
module attributes {stable_mosaic.version = 11 : i64} {
  func.func @_linear_kernel(%arg0: i32, %arg1: memref<16x128xf32, #tpu.memory_space<vmem>>, %arg2: memref<128x384xf32, #tpu.memory_space<vmem>>, %arg3: memref<1x384xf32, #tpu.memory_space<vmem>>, %arg4: memref<16x384xf32, #tpu.memory_space<vmem>>) attributes {dimension_semantics = [#tpu.dimension_semantics<parallel>], iteration_bounds = array<i64: 1>, scalar_prefetch = 0 : i64, scratch_operands = 0 : i64, tpu.core_type = #tpu.core_type<tc>, window_params = [{transform_indices = @transform_0, window_bounds = array<i64: 16, 128>}, {pipeline_mode = #tpu.pipeline_mode<synchronous>, transform_indices = @transform_1, window_bounds = array<i64: 128, 384>}, {pipeline_mode = #tpu.pipeline_mode<synchronous>, transform_indices = @transform_2, window_bounds = array<i64: 1, 384>}, {transform_indices = @transform_3, window_bounds = array<i64: 16, 384>}]} {
    %c0 = arith.constant 0 : index
    %c0_0 = arith.constant 0 : index
    %0 = vector.load %arg1[%c0, %c0_0] : memref<16x128xf32, #tpu.memory_space<vmem>>, vector<16x128xf32>
    %c0_1 = arith.constant 0 : index
    %c0_2 = arith.constant 0 : index
    %1 = vector.load %arg2[%c0_1, %c0_2] : memref<128x384xf32, #tpu.memory_space<vmem>>, vector<128x384xf32>
    %cst = arith.constant dense<0.000000e+00> : vector<16x384xf32>
    %2 = tpu.matmul %0, %1, %cst {dimension_numbers = #tpu.dot_dimension_numbers<[1], [0], [0], [1], [0, 0, 1, 1], [], []>} : vector<16x128xf32>, vector<128x384xf32>, vector<16x384xf32> -> vector<16x384xf32>
    %c0_3 = arith.constant 0 : index
    %c0_4 = arith.constant 0 : index
    %3 = vector.load %arg3[%c0_3, %c0_4] : memref<1x384xf32, #tpu.memory_space<vmem>>, vector<1x384xf32>
    %4 = vector.broadcast %3 : vector<1x384xf32> to vector<16x384xf32>
    %5 = arith.addf %2, %4 : vector<16x384xf32>
    %c0_5 = arith.constant 0 : index
    %c0_6 = arith.constant 0 : index
    %6 = vector.load %arg4[%c0_5, %c0_6] : memref<16x384xf32, #tpu.memory_space<vmem>>, vector<16x384xf32>
    tpu.vector_store %arg4[%c0_5, %c0_6], %5 {strides = array<i32>} : memref<16x384xf32, #tpu.memory_space<vmem>>, vector<16x384xf32>,
    return
  }
  func.func @transform_0(%arg0: i32) -> (i32, i32) {
    %c0_i32 = arith.constant 0 : i32
    %c0_i32_0 = arith.constant 0 : i32
    return %arg0, %c0_i32 : i32, i32
  }
  func.func @transform_1(%arg0: i32) -> (i32, i32) {
    %c0_i32 = arith.constant 0 : i32
    %c0_i32_0 = arith.constant 0 : i32
    %c0_i32_1 = arith.constant 0 : i32
    return %c0_i32, %c0_i32_0 : i32, i32
  }
  func.func @transform_2(%arg0: i32) -> (i32, i32) {
    %c0_i32 = arith.constant 0 : i32
    %c0_i32_0 = arith.constant 0 : i32
    %c0_i32_1 = arith.constant 0 : i32
    return %c0_i32, %c0_i32_0 : i32, i32
  }
  func.func @transform_3(%arg0: i32) -> (i32, i32) {
    %c0_i32 = arith.constant 0 : i32
    %c0_i32_0 = arith.constant 0 : i32
    return %arg0, %c0_i32 : i32, i32
  }
}

module attributes {stable_mosaic.version = 11 : i64} {
  func.func @_linear_kernel(%arg0: i32, %arg1: memref<16x128xf32, #tpu.memory_space<vmem>>, %arg2: memref<128x384xf32, #tpu.memory_space<vmem>>, %arg3: memref<1x384xf32, #tpu.memory_space<vmem>>, %arg4: memref<16x384xf32, #tpu.memory_space<vmem>>) attributes {dimension_semantics = [#tpu.dimension_semantics<parallel>], iteration_bounds = array<i64: 1>, scalar_prefetch = 0 : i64, scratch_operands = 0 : i64, tpu.core_type = #tpu.core_type<tc>, window_params = [{transform_indices = @transform_0, window_bounds = array<i64: 16, 128>}, {pipeline_mode = #tpu.pipeline_mode<synchronous>, transform_indices = @transform_1, window_bounds = array<i64: 128, 384>}, {pipeline_mode = #tpu.pipeline_mode<synchronous>, transform_indices = @transform_2, window_bounds = array<i64: 1, 384>}, {transform_indices = @transform_3, window_bounds = array<i64: 16, 384>}]} {
    %c0 = arith.constant 0 : index
    %c0_0 = arith.constant 0 : index
    %0 = vector.load %arg1[%c0, %c0_0] : memref<16x128xf32, #tpu.memory_space<vmem>>, vector<16x128xf32>
    %c0_1 = arith.constant 0 : index
    %c0_2 = arith.constant 0 : index
    %1 = vector.load %arg2[%c0_1, %c0_2] : memref<128x384xf32, #tpu.memory_space<vmem>>, vector<128x384xf32>
    %cst = arith.constant dense<0.000000e+00> : vector<16x384xf32>
    %2 = tpu.matmul %0, %1, %cst {dimension_numbers = #tpu.dot_dimension_numbers<[1], [0], [0], [1], [0, 0, 1, 1], [], []>} : vector<16x128xf32>, vector<128x384xf32>, vector<16x384xf32> -> vector<16x384xf32>
    %c0_3 = arith.constant 0 : index
    %c0_4 = arith.constant 0 : index
    %3 = vector.load %arg3[%c0_3, %c0_4] : memref<1x384xf32, #tpu.memory_space<vmem>>, vector<1x384xf32>
    %4 = vector.broadcast %3 : vector<1x384xf32> to vector<16x384xf32>
    %5 = arith.addf %2, %4 : vector<16x384xf32>
    %c0_5 = arith.constant 0 : index
    %c0_6 = arith.constant 0 : index
    %6 = vector.load %arg4[%c0_5, %c0_6] : memref<16x384xf32, #tpu.memory_space<vmem>>, vector<16x384xf32>
    tpu.vector_store %arg4[%c0_5, %c0_6], %5 {strides = array<i32>} : memref<16x384xf32, #tpu.memory_space<vmem>>, vector<16x384xf32>,
    return
  }
  func.func @transform_0(%arg0: i32) -> (i32, i32) {
    %c0_i32 = arith.constant 0 : i32
    %c0_i32_0 = arith.constant 0 : i32
    return %arg0, %c0_i32 : i32, i32
  }
  func.func @transform_1(%arg0: i32) -> (i32, i32) {
    %c0_i32 = arith.constant 0 : i32
    %c0_i32_0 = arith.constant 0 : i32
    %c0_i32_1 = arith.constant 0 : i32
    return %c0_i32, %c0_i32_0 : i32, i32
  }
  func.func @transform_2(%arg0: i32) -> (i32, i32) {
    %c0_i32 = arith.constant 0 : i32
    %c0_i32_0 = arith.constant 0 : i32
    %c0_i32_1 = arith.constant 0 : i32
    return %c0_i32, %c0_i32_0 : i32, i32
  }
  func.func @transform_3(%arg0: i32) -> (i32, i32) {
    %c0_i32 = arith.constant 0 : i32
    %c0_i32_0 = arith.constant 0 : i32
    return %arg0, %c0_i32 : i32, i32
  }
}

</mosaic_0001>

<bundles_post_ra>
// kernel: tpu_custom_call.1
= control target key start
LH: loop header
LB: loop body
LE: loop exit
PB: predicated region body
PF: predicated region fallthrough
CT: control target
= control target key end

     0   :  { %8 = vsyncpa [#allocation3], 0  ;;  %s461_s0 = inlined_call_operand.hbm [shape: f32[16,128], index: 0, kind: input, shape index: {}]   ;;  %s462_s1 = inlined_call_operand.hbm [shape: f32[128,384], index: 1, kind: input, shape index: {}]   ;;  %s463_s2 = inlined_call_operand.vmem [shape: f32[1,384], index: 2, kind: input, shape index: {}]   ;;  %s464_s3 = inlined_call_operand.hbm [shape: f32[16,384], index: 3, kind: output, shape index: {}]  }
   0x1   :  { %9 = vsyncpa [#allocation6], 0 }
   0x2   :  { %10 = vsyncpa [#allocation4], 0  ;;  %s413_s12 = smov [#allocation2]  }
   0x3   :  { %s16_s13 = sshll.u32 %s413_s12, 4  ;;  %s17_s13 = int_to_ptr.vmem [resolvable:$true] %s16_s13 }
   0x4   :  { %s355_s14 = scalar_lea.vmem %s17_s13, 256  ;;  %p360_p1 = scmp.lt.s32.totalorder %s17_s13, %s17_s13 }
   0x5   :  { %p356_p0 = scmp.ne.s32.totalorder %s17_s13, %s355_s14  ;;  %p361_p2 = scmp.lt.s32.totalorder %s355_s14, %s355_s14 }
   0x7   :  { %p362_p3 = por %p361_p2, %p360_p1 }
   0x9   :  { %p363_p4 = pnand %p362_p3, %p356_p0 }
   0xb   :  { %366 = shalt.err (!%p363_p4)
}
   0xc   :  { %s414_s15 = smov 128   ;;  %s415_s16 = smov 8  }
   0xd   :  { %22 = dma.hbm_to_vmem [thread:$0]  %s461_s0, 256, %s17_s13, [#allocation3], %s414_s15, %s414_s15, %s415_s16  }
   0xe   :  { %s416_s19 = smov [#allocation5]  }
   0xf   :  { %s28_s20 = sshll.u32 %s416_s19, 4  ;;  %s29_s20 = int_to_ptr.vmem [resolvable:$true] %s28_s20 }
  0x10   :  { %s375_s21 = scalar_lea.vmem %s29_s20, 6144  ;;  %p380_p6 = scmp.lt.s32.totalorder %s29_s20, %s29_s20 }
  0x11   :  { %p376_p5 = scmp.ne.s32.totalorder %s29_s20, %s375_s21  ;;  %p381_p7 = scmp.lt.s32.totalorder %s375_s21, %s375_s21 }
  0x13   :  { %p382_p8 = por %p381_p7, %p380_p6 }
  0x15   :  { %p383_p9 = pnand %p382_p8, %p376_p5 }
  0x17   :  { %386 = shalt.err (!%p383_p9)
}
  0x18   :  { %s417_s22 = smov 384   ;;  %s418_s23 = smov 24  }
  0x19   :  { %34 = dma.hbm_to_vmem [thread:$0]  %s462_s1, 6144, %s29_s20, [#allocation6], %s417_s22, %s417_s22, %s418_s23  }
  0x1a   :  { %407 = dma.done.wait [#allocation3], 256  }
  0x1b   :  { %408 = vsyncadd [#allocation3], 4294967040 }
  0x1c   :  { %409 = dma.done.wait [#allocation6], 6144  }
  0x1d   :  { %410 = vsyncadd [#allocation6], 4294961152  ;;  %v419_v0 = vmov 0.0   ;;  %v91_v1 = vld [vmem:[#allocation5 + $0x170] sm:$0xff]  ;;  %v90_v2 = vld [vmem:[#allocation5 + $0x168] sm:$0xff]  ;;  %v95_v51 = vlaneseq  ;;  %s420_s26 = smov [#allocation7]  }
  0x1e   :  { %174 = vmatprep.mubr.f32.mxu0 %v419_v0  ;;  %v88_v3 = vld [vmem:[#allocation5 + $0x158] sm:$0xff]  ;;  %110 = vmatprep.subr.mxu0 %v91_v1  ;;  %v87_v5 = vld [vmem:[#allocation5 + $0x150] sm:$0xff]  ;;  %v85_v6 = vld [vmem:[#allocation5 + $0x140] sm:$0xff]  ;;  %s273_s27 = sshll.u32 %s420_s26, 4  ;;  %s274_s27 = int_to_ptr.vmem [resolvable:$true] %s273_s27 }
  0x1f   :  { %v92_v4 = vld [vmem:[#allocation5 + $0x178] sm:$0xff]  ;;  %111 = vmatpush1.msra.mxu0 %v90_v2  ;;  %v89_v7 = vld [vmem:[#allocation5 + $0x160] sm:$0xff]  ;;  %v86_v9 = vld [vmem:[#allocation5 + $0x148] sm:$0xff]  ;;  %v96_v52 = vshrl.u32 %v95_v51, 7  ;;  %p392_p11 = scmp.lt.s32.totalorder %s274_s27, %s274_s27 }
  0x20   :  { %304 = vmatprep.subr.mxu1 %v92_v4  ;;  %112 = vmatprep.subr.mxu0 %v88_v3  ;;  %v84_v8 = vld [vmem:[#allocation5 + $0x138] sm:$0xff]  ;;  %v82_v10 = vld [vmem:[#allocation5 + $0x128] sm:$0xff]  ;;  %v81_v11 = vld [vmem:[#allocation5 + $0x120] sm:$0xff] }
  0x21   :  { %305 = vmatpush3.msra.mxu1 %v92_v4  ;;  %113 = vmatpush1.msra.mxu0 %v87_v5  ;;  %v83_v12 = vld [vmem:[#allocation5 + $0x130] sm:$0xff]  ;;  %v78_v14 = vld [vmem:[#allocation5 + $0x108] sm:$0xff]  ;;  %v80_v15 = vld [vmem:[#allocation5 + $0x118] sm:$0xff]  ;;  %v97_v53 = vsub.s32 0, %v96_v52  ;;  %v101_v55 = vsub.s32 1, %v96_v52  ;;  %v105_v56 = vsub.s32 2, %v96_v52 }
  0x22   :  { %306 = vmatprep.subr.mxu1 %v89_v7  ;;  %114 = vmatprep.subr.mxu0 %v85_v6  ;;  %v79_v13 = vld [vmem:[#allocation5 + $0x110] sm:$0xff]  ;;  %v76_v16 = vld [vmem:[#allocation5 + $0xf8] sm:$0xff]  ;;  %v77_v18 = vld [vmem:[#allocation5 + $0x100] sm:$0xff] }
  0x23   :  { %307 = vmatpush3.msra.mxu1 %v89_v7  ;;  %115 = vmatpush1.msra.mxu0 %v84_v8  ;;  %v75_v17 = vld [vmem:[#allocation5 + $0xf0] sm:$0xff]  ;;  %v73_v19 = vld [vmem:[#allocation5 + $0xe0] sm:$0xff]  ;;  %v72_v20 = vld [vmem:[#allocation5 + $0xd8] sm:$0xff] }
  0x24   :  { %308 = vmatprep.subr.mxu1 %v86_v9  ;;  %116 = vmatprep.subr.mxu0 %v82_v10  ;;  %v74_v21 = vld [vmem:[#allocation5 + $0xe8] sm:$0xff]  ;;  %v69_v23 = vld [vmem:[#allocation5 + $0xc0] sm:$0xff]  ;;  %v71_v24 = vld [vmem:[#allocation5 + $0xd0] sm:$0xff] }
  0x25   :  { %309 = vmatpush3.msra.mxu1 %v86_v9  ;;  %117 = vmatpush1.msra.mxu0 %v81_v11  ;;  %v70_v22 = vld [vmem:[#allocation5 + $0xc8] sm:$0xff]  ;;  %v67_v25 = vld [vmem:[#allocation5 + $0xb0] sm:$0xff]  ;;  %v68_v27 = vld [vmem:[#allocation5 + $0xb8] sm:$0xff] }
  0x26   :  { %310 = vmatprep.subr.mxu1 %v83_v12  ;;  %118 = vmatprep.subr.mxu0 %v79_v13  ;;  %v66_v26 = vld [vmem:[#allocation5 + $0xa8] sm:$0xff]  ;;  %v64_v28 = vld [vmem:[#allocation5 + $0x98] sm:$0xff]  ;;  %v63_v29 = vld [vmem:[#allocation5 + $0x90] sm:$0xff] }
  0x27   :  { %311 = vmatpush3.msra.mxu1 %v83_v12  ;;  %119 = vmatpush1.msra.mxu0 %v78_v14  ;;  %v65_v30 = vld [vmem:[#allocation5 + $0xa0] sm:$0xff]  ;;  %v60_v32 = vld [vmem:[#allocation5 + $0x78] sm:$0xff]  ;;  %v62_v33 = vld [vmem:[#allocation5 + $0x88] sm:$0xff] }
  0x28   :  { %312 = vmatprep.subr.mxu1 %v80_v15  ;;  %120 = vmatprep.subr.mxu0 %v76_v16  ;;  %v61_v31 = vld [vmem:[#allocation5 + $0x80] sm:$0xff]  ;;  %v58_v34 = vld [vmem:[#allocation5 + $0x68] sm:$0xff]  ;;  %v59_v36 = vld [vmem:[#allocation5 + $0x70] sm:$0xff] }
  0x29   :  { %313 = vmatpush3.msra.mxu1 %v80_v15  ;;  %121 = vmatpush1.msra.mxu0 %v75_v17  ;;  %v57_v35 = vld [vmem:[#allocation5 + $0x60] sm:$0xff]  ;;  %v55_v37 = vld [vmem:[#allocation5 + $0x50] sm:$0xff]  ;;  %v54_v38 = vld [vmem:[#allocation5 + $0x48] sm:$0xff] }
  0x2a   :  { %314 = vmatprep.subr.mxu1 %v77_v18  ;;  %122 = vmatprep.subr.mxu0 %v73_v19  ;;  %v56_v39 = vld [vmem:[#allocation5 + $0x58] sm:$0xff]  ;;  %v51_v41 = vld [vmem:[#allocation5 + $0x30] sm:$0xff]  ;;  %v53_v42 = vld [vmem:[#allocation5 + $0x40] sm:$0xff] }
  0x2b   :  { %315 = vmatpush3.msra.mxu1 %v77_v18  ;;  %123 = vmatpush1.msra.mxu0 %v72_v20  ;;  %v52_v40 = vld [vmem:[#allocation5 + $0x38] sm:$0xff]  ;;  %v49_v43 = vld [vmem:[#allocation5 + $0x20] sm:$0xff]  ;;  %v50_v45 = vld [vmem:[#allocation5 + $0x28] sm:$0xff] }
  0x2c   :  { %316 = vmatprep.subr.mxu1 %v74_v21  ;;  %124 = vmatprep.subr.mxu0 %v70_v22  ;;  %v48_v44 = vld [vmem:[#allocation5 + $0x18] sm:$0xff]  ;;  %v46_v46 = vld [vmem:[#allocation5 + $0x8] sm:$0xff]  ;;  %v45_v47 = vld [vmem:[#allocation5] sm:$0xff] }
  0x2d   :  { %317 = vmatpush3.msra.mxu1 %v74_v21  ;;  %125 = vmatpush1.msra.mxu0 %v69_v23  ;;  %v47_v48 = vld [vmem:[#allocation5 + $0x10] sm:$0xff]  ;;  %v44_v50 = vld [vmem:[#allocation2 + $0x8] sm:$0xff] }
  0x2e   :  { %318 = vmatprep.subr.mxu1 %v71_v24  ;;  %126 = vmatprep.subr.mxu0 %v67_v25  ;;  %v43_v49 = vld [vmem:[#allocation2] sm:$0xff] }
  0x2f   :  { %319 = vmatpush3.msra.mxu1 %v71_v24  ;;  %127 = vmatpush1.msra.mxu0 %v66_v26  ;;  %v93_v54 = vld [vmem:[%s463_s2] sm:$0x7]  ;;  %s387_s2 = scalar_lea.vmem %s274_s27, 768 }
  0x30   :  { %320 = vmatprep.subr.mxu1 %v68_v27  ;;  %128 = vmatprep.subr.mxu0 %v64_v28  ;;  %v98_v57 = vrot.slane %v93_v54, %v97_v53  ;;  %v102_v58 = vrot.slane %v93_v54, %v101_v55  ;;  %v106_v59 = vrot.slane %v93_v54, %v105_v56  ;;  %p388_p10 = scmp.ne.s32.totalorder %s274_s27, %s387_s2  ;;  %p393_p12 = scmp.lt.s32.totalorder %s387_s2, %s387_s2 }
  0x31   :  { %321 = vmatpush3.msra.mxu1 %v68_v27  ;;  %129 = vmatpush1.msra.mxu0 %v63_v29 }
  0x32   :  { %322 = vmatprep.subr.mxu1 %v65_v30  ;;  %130 = vmatprep.subr.mxu0 %v61_v31  ;;  %p394_p13 = por %p393_p12, %p392_p11 }
  0x33   :  { %323 = vmatpush3.msra.mxu1 %v65_v30  ;;  %131 = vmatpush1.msra.mxu0 %v60_v32 }
  0x34   :  { %324 = vmatprep.subr.mxu1 %v62_v33  ;;  %132 = vmatprep.subr.mxu0 %v58_v34  ;;  %p395_p0 = pnand %p394_p13, %p388_p10 }
  0x35   :  { %325 = vmatpush3.msra.mxu1 %v62_v33  ;;  %133 = vmatpush1.msra.mxu0 %v57_v35 }
  0x36   :  { %326 = vmatprep.subr.mxu1 %v59_v36  ;;  %134 = vmatprep.subr.mxu0 %v55_v37 }
  0x37   :  { %327 = vmatpush3.msra.mxu1 %v59_v36  ;;  %135 = vmatpush1.msra.mxu0 %v54_v38 }
  0x38   :  { %328 = vmatprep.subr.mxu1 %v56_v39  ;;  %136 = vmatprep.subr.mxu0 %v52_v40 }
  0x39   :  { %329 = vmatpush3.msra.mxu1 %v56_v39  ;;  %137 = vmatpush1.msra.mxu0 %v51_v41 }
  0x3a   :  { %330 = vmatprep.subr.mxu1 %v53_v42  ;;  %138 = vmatprep.subr.mxu0 %v49_v43 }
  0x3b   :  { %331 = vmatpush3.msra.mxu1 %v53_v42  ;;  %139 = vmatpush1.msra.mxu0 %v48_v44 }
  0x3c   :  { %332 = vmatprep.subr.mxu1 %v50_v45  ;;  %140 = vmatprep.subr.mxu0 %v46_v46 }
  0x3d   :  { %333 = vmatpush3.msra.mxu1 %v50_v45  ;;  %141 = vmatpush1.msra.mxu0 %v45_v47 }
  0x3e   :  { %334 = vmatprep.subr.mxu1 %v47_v48  ;;  %175 = vmatmul.mubr.f32.vlgmr.msra.gmra.mxu0 %v43_v49 }
  0x3f   :  { %335 = vmatpush3.msra.mxu1 %v47_v48  ;;  %336 = vmatprep.mubr.f32.mxu1 %v43_v49 }
  0x40   :  { %180 = vmatprep.mubr.f32.mxu0 %v419_v0  ;;  %337 = vmatmul.mubr.f32.vlgmr.msra.gmra.mxu1 %v44_v50 }
  0x42   :  { %181 = vmatmul.mubr.f32.gmra.mxu0 %v44_v50 }
  0xfe   :  { %v176_v60 = vpop.f32.mrf.mxu0 }
  0xff   :  { %v177_v61 = vadd.f32 %v176_v60, %v98_v57 }
 0x100   :  { %v178_v62 = vpop.f32.mrf.mxu0  ;;  %v338_v63 = vpop.f32.mrf.mxu1 }
 0x101   :  { %262 = vst [vmem:[#allocation7] sm:$0xff] %v177_v61  ;;  %v179_v0 = vadd.f32 %v178_v62, %v102_v58  ;;  %v259_v1 = vadd.f32 %v338_v63, %v106_v59 }
 0x102   :  { %v182_v2 = vpop.f32.mrf.mxu0  ;;  %v253_v3 = vpop.f32.mrf.mxu1 }
 0x103   :  { %263 = vst [vmem:[#allocation7 + $0x8] sm:$0xff] %v179_v0  ;;  %267 = vst [vmem:[#allocation7 + $0x28] sm:$0xff] %v259_v1  ;;  %v183_v4 = vadd.f32 %v182_v2, %v98_v57  ;;  %v254_v5 = vadd.f32 %v253_v3, %v106_v59 }
 0x104   :  { %v184_v6 = vpop.f32.mrf.mxu0 }
 0x105   :  { %265 = vst [vmem:[#allocation7 + $0x18] sm:$0xff] %v183_v4  ;;  %264 = vst [vmem:[#allocation7 + $0x10] sm:$0xff] %v254_v5  ;;  %v185_v7 = vadd.f32 %v184_v6, %v102_v58 }
 0x107   :  { %266 = vst [vmem:[#allocation7 + $0x20] sm:$0xff] %v185_v7 }
 0x108   :  { %398 = shalt.err (!%p395_p0)
}
 0x109   :  { %279 = dma.vmem_to_hbm [thread:$0]  %s274_s27, 768, %s464_s3, [#allocation4], %s417_s22, %s417_s22, %s418_s23  }
 0x10a   :  { %411 = dma.done.wait [#allocation4], 768  }
 0x10b   :  { %412 = vsyncadd [#allocation4], 4294966528 }
 0x10c   :  { %283 = vsyncpa [#allocation3], 1 }
 0x10d   :  { %284 = vsyncpa [#allocation6], 1 }
 0x10e   :  { %285 = vsyncpa [#allocation4], 1 }

// kernel: tpu_custom_call.1
= control target key start
LH: loop header
LB: loop body
LE: loop exit
PB: predicated region body
PF: predicated region fallthrough
CT: control target
= control target key end

     0   :  { %8 = vsyncpa [#allocation3], 0  ;;  %s461_s0 = inlined_call_operand.hbm [shape: f32[16,128], index: 0, kind: input, shape index: {}]   ;;  %s462_s1 = inlined_call_operand.hbm [shape: f32[128,384], index: 1, kind: input, shape index: {}]   ;;  %s463_s2 = inlined_call_operand.vmem [shape: f32[1,384], index: 2, kind: input, shape index: {}]   ;;  %s464_s3 = inlined_call_operand.hbm [shape: f32[16,384], index: 3, kind: output, shape index: {}]  }
   0x1   :  { %9 = vsyncpa [#allocation6], 0 }
   0x2   :  { %10 = vsyncpa [#allocation4], 0  ;;  %s413_s12 = smov [#allocation2]  }
   0x3   :  { %s16_s13 = sshll.u32 %s413_s12, 4  ;;  %s17_s13 = int_to_ptr.vmem [resolvable:$true] %s16_s13 }
   0x4   :  { %s355_s14 = scalar_lea.vmem %s17_s13, 256  ;;  %p360_p1 = scmp.lt.s32.totalorder %s17_s13, %s17_s13 }
   0x5   :  { %p356_p0 = scmp.ne.s32.totalorder %s17_s13, %s355_s14  ;;  %p361_p2 = scmp.lt.s32.totalorder %s355_s14, %s355_s14 }
   0x7   :  { %p362_p3 = por %p361_p2, %p360_p1 }
   0x9   :  { %p363_p4 = pnand %p362_p3, %p356_p0 }
   0xb   :  { %366 = shalt.err (!%p363_p4)
}
   0xc   :  { %s414_s15 = smov 128   ;;  %s415_s16 = smov 8  }
   0xd   :  { %22 = dma.hbm_to_vmem [thread:$0]  %s461_s0, 256, %s17_s13, [#allocation3], %s414_s15, %s414_s15, %s415_s16  }
   0xe   :  { %s416_s19 = smov [#allocation5]  }
   0xf   :  { %s28_s20 = sshll.u32 %s416_s19, 4  ;;  %s29_s20 = int_to_ptr.vmem [resolvable:$true] %s28_s20 }
  0x10   :  { %s375_s21 = scalar_lea.vmem %s29_s20, 6144  ;;  %p380_p6 = scmp.lt.s32.totalorder %s29_s20, %s29_s20 }
  0x11   :  { %p376_p5 = scmp.ne.s32.totalorder %s29_s20, %s375_s21  ;;  %p381_p7 = scmp.lt.s32.totalorder %s375_s21, %s375_s21 }
  0x13   :  { %p382_p8 = por %p381_p7, %p380_p6 }
  0x15   :  { %p383_p9 = pnand %p382_p8, %p376_p5 }
  0x17   :  { %386 = shalt.err (!%p383_p9)
}
  0x18   :  { %s417_s22 = smov 384   ;;  %s418_s23 = smov 24  }
  0x19   :  { %34 = dma.hbm_to_vmem [thread:$0]  %s462_s1, 6144, %s29_s20, [#allocation6], %s417_s22, %s417_s22, %s418_s23  }
  0x1a   :  { %407 = dma.done.wait [#allocation3], 256  }
  0x1b   :  { %408 = vsyncadd [#allocation3], 4294967040 }
  0x1c   :  { %409 = dma.done.wait [#allocation6], 6144  }
  0x1d   :  { %410 = vsyncadd [#allocation6], 4294961152  ;;  %v419_v0 = vmov 0.0   ;;  %v91_v1 = vld [vmem:[#allocation5 + $0x170] sm:$0xff]  ;;  %v90_v2 = vld [vmem:[#allocation5 + $0x168] sm:$0xff]  ;;  %v95_v51 = vlaneseq  ;;  %s420_s26 = smov [#allocation7]  }
  0x1e   :  { %174 = vmatprep.mubr.f32.mxu0 %v419_v0  ;;  %v88_v3 = vld [vmem:[#allocation5 + $0x158] sm:$0xff]  ;;  %110 = vmatprep.subr.mxu0 %v91_v1  ;;  %v87_v5 = vld [vmem:[#allocation5 + $0x150] sm:$0xff]  ;;  %v85_v6 = vld [vmem:[#allocation5 + $0x140] sm:$0xff]  ;;  %s273_s27 = sshll.u32 %s420_s26, 4  ;;  %s274_s27 = int_to_ptr.vmem [resolvable:$true] %s273_s27 }
  0x1f   :  { %v92_v4 = vld [vmem:[#allocation5 + $0x178] sm:$0xff]  ;;  %111 = vmatpush1.msra.mxu0 %v90_v2  ;;  %v89_v7 = vld [vmem:[#allocation5 + $0x160] sm:$0xff]  ;;  %v86_v9 = vld [vmem:[#allocation5 + $0x148] sm:$0xff]  ;;  %v96_v52 = vshrl.u32 %v95_v51, 7  ;;  %p392_p11 = scmp.lt.s32.totalorder %s274_s27, %s274_s27 }
  0x20   :  { %304 = vmatprep.subr.mxu1 %v92_v4  ;;  %112 = vmatprep.subr.mxu0 %v88_v3  ;;  %v84_v8 = vld [vmem:[#allocation5 + $0x138] sm:$0xff]  ;;  %v82_v10 = vld [vmem:[#allocation5 + $0x128] sm:$0xff]  ;;  %v81_v11 = vld [vmem:[#allocation5 + $0x120] sm:$0xff] }
  0x21   :  { %305 = vmatpush3.msra.mxu1 %v92_v4  ;;  %113 = vmatpush1.msra.mxu0 %v87_v5  ;;  %v83_v12 = vld [vmem:[#allocation5 + $0x130] sm:$0xff]  ;;  %v78_v14 = vld [vmem:[#allocation5 + $0x108] sm:$0xff]  ;;  %v80_v15 = vld [vmem:[#allocation5 + $0x118] sm:$0xff]  ;;  %v97_v53 = vsub.s32 0, %v96_v52  ;;  %v101_v55 = vsub.s32 1, %v96_v52  ;;  %v105_v56 = vsub.s32 2, %v96_v52 }
  0x22   :  { %306 = vmatprep.subr.mxu1 %v89_v7  ;;  %114 = vmatprep.subr.mxu0 %v85_v6  ;;  %v79_v13 = vld [vmem:[#allocation5 + $0x110] sm:$0xff]  ;;  %v76_v16 = vld [vmem:[#allocation5 + $0xf8] sm:$0xff]  ;;  %v77_v18 = vld [vmem:[#allocation5 + $0x100] sm:$0xff] }
  0x23   :  { %307 = vmatpush3.msra.mxu1 %v89_v7  ;;  %115 = vmatpush1.msra.mxu0 %v84_v8  ;;  %v75_v17 = vld [vmem:[#allocation5 + $0xf0] sm:$0xff]  ;;  %v73_v19 = vld [vmem:[#allocation5 + $0xe0] sm:$0xff]  ;;  %v72_v20 = vld [vmem:[#allocation5 + $0xd8] sm:$0xff] }
  0x24   :  { %308 = vmatprep.subr.mxu1 %v86_v9  ;;  %116 = vmatprep.subr.mxu0 %v82_v10  ;;  %v74_v21 = vld [vmem:[#allocation5 + $0xe8] sm:$0xff]  ;;  %v69_v23 = vld [vmem:[#allocation5 + $0xc0] sm:$0xff]  ;;  %v71_v24 = vld [vmem:[#allocation5 + $0xd0] sm:$0xff] }
  0x25   :  { %309 = vmatpush3.msra.mxu1 %v86_v9  ;;  %117 = vmatpush1.msra.mxu0 %v81_v11  ;;  %v70_v22 = vld [vmem:[#allocation5 + $0xc8] sm:$0xff]  ;;  %v67_v25 = vld [vmem:[#allocation5 + $0xb0] sm:$0xff]  ;;  %v68_v27 = vld [vmem:[#allocation5 + $0xb8] sm:$0xff] }
  0x26   :  { %310 = vmatprep.subr.mxu1 %v83_v12  ;;  %118 = vmatprep.subr.mxu0 %v79_v13  ;;  %v66_v26 = vld [vmem:[#allocation5 + $0xa8] sm:$0xff]  ;;  %v64_v28 = vld [vmem:[#allocation5 + $0x98] sm:$0xff]  ;;  %v63_v29 = vld [vmem:[#allocation5 + $0x90] sm:$0xff] }
  0x27   :  { %311 = vmatpush3.msra.mxu1 %v83_v12  ;;  %119 = vmatpush1.msra.mxu0 %v78_v14  ;;  %v65_v30 = vld [vmem:[#allocation5 + $0xa0] sm:$0xff]  ;;  %v60_v32 = vld [vmem:[#allocation5 + $0x78] sm:$0xff]  ;;  %v62_v33 = vld [vmem:[#allocation5 + $0x88] sm:$0xff] }
  0x28   :  { %312 = vmatprep.subr.mxu1 %v80_v15  ;;  %120 = vmatprep.subr.mxu0 %v76_v16  ;;  %v61_v31 = vld [vmem:[#allocation5 + $0x80] sm:$0xff]  ;;  %v58_v34 = vld [vmem:[#allocation5 + $0x68] sm:$0xff]  ;;  %v59_v36 = vld [vmem:[#allocation5 + $0x70] sm:$0xff] }
  0x29   :  { %313 = vmatpush3.msra.mxu1 %v80_v15  ;;  %121 = vmatpush1.msra.mxu0 %v75_v17  ;;  %v57_v35 = vld [vmem:[#allocation5 + $0x60] sm:$0xff]  ;;  %v55_v37 = vld [vmem:[#allocation5 + $0x50] sm:$0xff]  ;;  %v54_v38 = vld [vmem:[#allocation5 + $0x48] sm:$0xff] }
  0x2a   :  { %314 = vmatprep.subr.mxu1 %v77_v18  ;;  %122 = vmatprep.subr.mxu0 %v73_v19  ;;  %v56_v39 = vld [vmem:[#allocation5 + $0x58] sm:$0xff]  ;;  %v51_v41 = vld [vmem:[#allocation5 + $0x30] sm:$0xff]  ;;  %v53_v42 = vld [vmem:[#allocation5 + $0x40] sm:$0xff] }
  0x2b   :  { %315 = vmatpush3.msra.mxu1 %v77_v18  ;;  %123 = vmatpush1.msra.mxu0 %v72_v20  ;;  %v52_v40 = vld [vmem:[#allocation5 + $0x38] sm:$0xff]  ;;  %v49_v43 = vld [vmem:[#allocation5 + $0x20] sm:$0xff]  ;;  %v50_v45 = vld [vmem:[#allocation5 + $0x28] sm:$0xff] }
  0x2c   :  { %316 = vmatprep.subr.mxu1 %v74_v21  ;;  %124 = vmatprep.subr.mxu0 %v70_v22  ;;  %v48_v44 = vld [vmem:[#allocation5 + $0x18] sm:$0xff]  ;;  %v46_v46 = vld [vmem:[#allocation5 + $0x8] sm:$0xff]  ;;  %v45_v47 = vld [vmem:[#allocation5] sm:$0xff] }
  0x2d   :  { %317 = vmatpush3.msra.mxu1 %v74_v21  ;;  %125 = vmatpush1.msra.mxu0 %v69_v23  ;;  %v47_v48 = vld [vmem:[#allocation5 + $0x10] sm:$0xff]  ;;  %v44_v50 = vld [vmem:[#allocation2 + $0x8] sm:$0xff] }
  0x2e   :  { %318 = vmatprep.subr.mxu1 %v71_v24  ;;  %126 = vmatprep.subr.mxu0 %v67_v25  ;;  %v43_v49 = vld [vmem:[#allocation2] sm:$0xff] }
  0x2f   :  { %319 = vmatpush3.msra.mxu1 %v71_v24  ;;  %127 = vmatpush1.msra.mxu0 %v66_v26  ;;  %v93_v54 = vld [vmem:[%s463_s2] sm:$0x7]  ;;  %s387_s2 = scalar_lea.vmem %s274_s27, 768 }
  0x30   :  { %320 = vmatprep.subr.mxu1 %v68_v27  ;;  %128 = vmatprep.subr.mxu0 %v64_v28  ;;  %v98_v57 = vrot.slane %v93_v54, %v97_v53  ;;  %v102_v58 = vrot.slane %v93_v54, %v101_v55  ;;  %v106_v59 = vrot.slane %v93_v54, %v105_v56  ;;  %p388_p10 = scmp.ne.s32.totalorder %s274_s27, %s387_s2  ;;  %p393_p12 = scmp.lt.s32.totalorder %s387_s2, %s387_s2 }
  0x31   :  { %321 = vmatpush3.msra.mxu1 %v68_v27  ;;  %129 = vmatpush1.msra.mxu0 %v63_v29 }
  0x32   :  { %322 = vmatprep.subr.mxu1 %v65_v30  ;;  %130 = vmatprep.subr.mxu0 %v61_v31  ;;  %p394_p13 = por %p393_p12, %p392_p11 }
  0x33   :  { %323 = vmatpush3.msra.mxu1 %v65_v30  ;;  %131 = vmatpush1.msra.mxu0 %v60_v32 }
  0x34   :  { %324 = vmatprep.subr.mxu1 %v62_v33  ;;  %132 = vmatprep.subr.mxu0 %v58_v34  ;;  %p395_p0 = pnand %p394_p13, %p388_p10 }
  0x35   :  { %325 = vmatpush3.msra.mxu1 %v62_v33  ;;  %133 = vmatpush1.msra.mxu0 %v57_v35 }
  0x36   :  { %326 = vmatprep.subr.mxu1 %v59_v36  ;;  %134 = vmatprep.subr.mxu0 %v55_v37 }
  0x37   :  { %327 = vmatpush3.msra.mxu1 %v59_v36  ;;  %135 = vmatpush1.msra.mxu0 %v54_v38 }
  0x38   :  { %328 = vmatprep.subr.mxu1 %v56_v39  ;;  %136 = vmatprep.subr.mxu0 %v52_v40 }
  0x39   :  { %329 = vmatpush3.msra.mxu1 %v56_v39  ;;  %137 = vmatpush1.msra.mxu0 %v51_v41 }
  0x3a   :  { %330 = vmatprep.subr.mxu1 %v53_v42  ;;  %138 = vmatprep.subr.mxu0 %v49_v43 }
  0x3b   :  { %331 = vmatpush3.msra.mxu1 %v53_v42  ;;  %139 = vmatpush1.msra.mxu0 %v48_v44 }
  0x3c   :  { %332 = vmatprep.subr.mxu1 %v50_v45  ;;  %140 = vmatprep.subr.mxu0 %v46_v46 }
  0x3d   :  { %333 = vmatpush3.msra.mxu1 %v50_v45  ;;  %141 = vmatpush1.msra.mxu0 %v45_v47 }
  0x3e   :  { %334 = vmatprep.subr.mxu1 %v47_v48  ;;  %175 = vmatmul.mubr.f32.vlgmr.msra.gmra.mxu0 %v43_v49 }
  0x3f   :  { %335 = vmatpush3.msra.mxu1 %v47_v48  ;;  %336 = vmatprep.mubr.f32.mxu1 %v43_v49 }
  0x40   :  { %180 = vmatprep.mubr.f32.mxu0 %v419_v0  ;;  %337 = vmatmul.mubr.f32.vlgmr.msra.gmra.mxu1 %v44_v50 }
  0x42   :  { %181 = vmatmul.mubr.f32.gmra.mxu0 %v44_v50 }
  0xfe   :  { %v176_v60 = vpop.f32.mrf.mxu0 }
  0xff   :  { %v177_v61 = vadd.f32 %v176_v60, %v98_v57 }
 0x100   :  { %v178_v62 = vpop.f32.mrf.mxu0  ;;  %v338_v63 = vpop.f32.mrf.mxu1 }
 0x101   :  { %262 = vst [vmem:[#allocation7] sm:$0xff] %v177_v61  ;;  %v179_v0 = vadd.f32 %v178_v62, %v102_v58  ;;  %v259_v1 = vadd.f32 %v338_v63, %v106_v59 }
 0x102   :  { %v182_v2 = vpop.f32.mrf.mxu0  ;;  %v253_v3 = vpop.f32.mrf.mxu1 }
 0x103   :  { %263 = vst [vmem:[#allocation7 + $0x8] sm:$0xff] %v179_v0  ;;  %267 = vst [vmem:[#allocation7 + $0x28] sm:$0xff] %v259_v1  ;;  %v183_v4 = vadd.f32 %v182_v2, %v98_v57  ;;  %v254_v5 = vadd.f32 %v253_v3, %v106_v59 }
 0x104   :  { %v184_v6 = vpop.f32.mrf.mxu0 }
 0x105   :  { %265 = vst [vmem:[#allocation7 + $0x18] sm:$0xff] %v183_v4  ;;  %264 = vst [vmem:[#allocation7 + $0x10] sm:$0xff] %v254_v5  ;;  %v185_v7 = vadd.f32 %v184_v6, %v102_v58 }
 0x107   :  { %266 = vst [vmem:[#allocation7 + $0x20] sm:$0xff] %v185_v7 }
 0x108   :  { %398 = shalt.err (!%p395_p0)
}
 0x109   :  { %279 = dma.vmem_to_hbm [thread:$0]  %s274_s27, 768, %s464_s3, [#allocation4], %s417_s22, %s417_s22, %s418_s23  }
 0x10a   :  { %411 = dma.done.wait [#allocation4], 768  }
 0x10b   :  { %412 = vsyncadd [#allocation4], 4294966528 }
 0x10c   :  { %283 = vsyncpa [#allocation3], 1 }
 0x10d   :  { %284 = vsyncpa [#allocation6], 1 }
 0x10e   :  { %285 = vsyncpa [#allocation4], 1 }

</bundles_post_ra>
